<compile_context>
chip_gen: v7x
topology: tpu7x:2x2x1
jax: 0.10.0
libtpu: 0.0.40
codegen_flags: <defaults>
</compile_context>

<pallas_src>
import numpy as np
import jax
import jax.numpy as jnp
from jax.experimental import pallas as pl
from jax.experimental.pallas import tpu as pltpu

K = 5          # TNet k == input feature dim (Conv1d(5, 16, 1))
KP = 8         # input channels padded 5 -> 8 inside the kernel
CPAD = 128     # hidden channel dims padded to 128 lanes
WLANES = 2 * CPAD   # weight slab is 256 lanes wide (for the [w2 | w4b] block)

# Weight-block indices inside the packed slab (each block is 128 rows x 256 lanes).
(I_TW1, I_TW2, I_TW3, I_TF1, I_TF2, I_TF3,
 I_W1, I_W2B, I_W34, I_W5, I_W6) = range(11)
NUM_BLOCKS = 11
SLAB_ROWS = NUM_BLOCKS * 128
BIAS_ROWS = NUM_BLOCKS * 8          # one 8-aligned f32 bias row per block


# --------------------------------------------------------------------------
# Kernel
# --------------------------------------------------------------------------
def _make_kernel(TB, N, nc_out):
    TBN = TB * N

    def kernel(x_ref, w_ref, b_ref, out_ref):
        # x_ref:   (TB, N, K)           f32 raw input points
        # w_ref:   (SLAB_ROWS, 256)     bf16 packed weights (resident)
        # b_ref:   (BIAS_ROWS, 256)     f32 biases (resident)
        # out_ref: (TB, N, nc_out)      f32 logits

        def wblk(idx, rows=CPAD, lanes=CPAD):
            return w_ref[idx * 128: idx * 128 + rows, :lanes]       # bf16

        def bias(idx, lanes=CPAD):
            return b_ref[idx * 8: idx * 8 + 1, :lanes]              # (1, lanes) f32

        def mm(a_bf16, idx, rows=CPAD, lanes=CPAD):
            return jnp.dot(a_bf16, wblk(idx, rows, lanes),
                           preferred_element_type=jnp.float32) + bias(idx, lanes)

        def rb(a):  # fused ReLU + single bf16 cast for the next MXU consumer
            return jnp.maximum(a, 0.0).astype(jnp.bfloat16)

        x5 = x_ref[...]                                             # (TB, N, K) f32
        x3d = jnp.concatenate(
            [x5, jnp.zeros((TB, N, KP - K), x5.dtype)], axis=-1)    # (TB, N, 8) f32
        x2d = x3d.reshape(TBN, KP).astype(jnp.bfloat16)

        # ---------------- TNet ----------------
        h = rb(mm(x2d, I_TW1, rows=KP))                # 16 real lanes
        h = rb(mm(h, I_TW2))                           # 32 real
        h = rb(mm(h, I_TW3))                           # 64 real
        g = jnp.max(h.reshape(TB, N, CPAD), axis=1)    # (TB, 128) per-batch max, bf16
        g = rb(mm(g, I_TF1))                           # 32 real
        g = rb(mm(g, I_TF2))                           # 16 real
        gt = mm(g, I_TF3)                              # (TB, 128) f32; transform rows
                                                       # re-laid at lanes [i*8, i*8+K)

        # xt = x @ (trans + I), batched over TB without reshaping to (K, K):
        #   xt[b, n, j] = x[b, n, j] + sum_i x[b, n, i] * T[b, i, j]
        gT = gt.reshape(TB, 1, CPAD)
        xt = x3d
        for i in range(K):
            xt = xt + x3d[:, :, i:i + 1] * gT[:, :, i * KP:(i + 1) * KP]
        xt2d = xt.reshape(TBN, KP).astype(jnp.bfloat16)

        # ------------- segmentation head -------------
        x1 = rb(mm(xt2d, I_W1, rows=KP))               # 16 real
        # one 256-wide matmul: lanes [0,128) = conv2 pre-ReLU, [128,256) = x1 @ w4b
        t = mm(x1, I_W2B, lanes=WLANES)                # (TBN, 256) f32
        x2 = rb(t[:, :CPAD])                           # 32 real (conv2 + bn2 + relu)
        c4 = t[:, CPAD:]                               # x1 @ w4[64:], f32
        # conv3/bn3 folded into w34: h4 = relu(x2 @ (w3 @ w4a) + x1 @ w4b + b34)
        h4 = rb(mm(x2, I_W34) + c4)                    # 32 real
        h5 = rb(mm(h4, I_W5))                          # 16 real
        out = mm(h5, I_W6)                             # (TBN, 128) f32, nc_out real

        out_ref[...] = out.reshape(TB, N, CPAD)[:, :, :nc_out].astype(out_ref.dtype)

    return kernel


# --------------------------------------------------------------------------
# Parameter packing (one resident bf16 weight slab + small f32 bias slab)
# --------------------------------------------------------------------------
def pack_params(params):
    """Pack weights into a (SLAB_ROWS, 256) bf16 slab and biases into a
    (BIAS_ROWS, 256) f32 slab.  BN (eval mode) is assumed already folded in.
    Folds conv3 into conv4's first half and packs [w2 | w4b] side by side."""
    wslab = np.zeros((SLAB_ROWS, WLANES), np.float32)
    bslab = np.zeros((BIAS_ROWS, WLANES), np.float32)

    def put_w(idx, w, col0=0):
        w = np.asarray(w, np.float32)
        r0 = idx * 128
        wslab[r0:r0 + w.shape[0], col0:col0 + w.shape[1]] = w

    def put_b(idx, b, col0=0):
        v = np.ravel(np.asarray(b, np.float32))
        bslab[idx * 8, col0:col0 + v.size] = v

    # Re-lay TNet fc3 output columns from row-major (K, K) to row-major (8, 8)
    # so the in-kernel transform loop can take 8-wide lane slices.
    tf3w = np.asarray(params["tf3w"], np.float32)            # (16, K*K)
    tf3b = np.ravel(np.asarray(params["tf3b"], np.float32))  # (K*K,)
    tf3w_p = np.zeros((tf3w.shape[0], 64), np.float32)
    tf3b_p = np.zeros((64,), np.float32)
    for i in range(K):
        tf3w_p[:, i * 8:i * 8 + K] = tf3w[:, i * K:(i + 1) * K]
        tf3b_p[i * 8:i * 8 + K] = tf3b[i * K:(i + 1) * K]

    # Fold conv3 (+bn3) into conv4's first 64 input channels (no ReLU between).
    w3 = np.asarray(params["w3"], np.float32)                # (32, 64)
    b3 = np.asarray(params["b3"], np.float32).reshape(1, -1)  # (1, 64)
    w4 = np.asarray(params["w4"], np.float32)                # (80, 32)
    b4 = np.asarray(params["b4"], np.float32).reshape(1, -1)  # (1, 32)
    w34 = w3 @ w4[:64]                                        # (32, 32)
    b34 = b3 @ w4[:64] + b4                                   # (1, 32)

    put_w(I_TW1, params["tw1"]); put_b(I_TW1, params["tb1"])
    put_w(I_TW2, params["tw2"]); put_b(I_TW2, params["tb2"])
    put_w(I_TW3, params["tw3"]); put_b(I_TW3, params["tb3"])
    put_w(I_TF1, params["tf1w"]); put_b(I_TF1, params["tf1b"])
    put_w(I_TF2, params["tf2w"]); put_b(I_TF2, params["tf2b"])
    put_w(I_TF3, tf3w_p); put_b(I_TF3, tf3b_p)
    put_w(I_W1, params["w1"]); put_b(I_W1, params["b1"])
    # Shared-LHS pair: [w2 | w4b] in one 256-lane block (bias: [b2 | 0]).
    put_w(I_W2B, params["w2"], 0); put_w(I_W2B, w4[64:], CPAD)
    put_b(I_W2B, params["b2"], 0)
    put_w(I_W34, w34); put_b(I_W34, b34)
    put_w(I_W5, params["w5"]); put_b(I_W5, params["b5"])
    put_w(I_W6, params["w6"]); put_b(I_W6, params["b6"])

    return jnp.asarray(wslab, jnp.bfloat16), jnp.asarray(bslab, jnp.float32)


# --------------------------------------------------------------------------
# Wrapper
# --------------------------------------------------------------------------
def _choose_tb(B, N, target_rows=8192):
    """Batch elements per grid step: ~target_rows rows, divides B, grid >= 2."""
    tb = max(1, min(B, max(1, target_rows // max(N, 1))))
    while B % tb:
        tb -= 1
    while B // tb < 2 and tb > 1:           # keep 2+ grid steps for megacore sharding
        tb -= 1
        while B % tb:
            tb -= 1
    return tb


def pointnet_seg(x, params, num_classes, target_rows=8192):
    """x: (B, N, 5) float32 -> (B, N, num_classes) float32."""
    B, N, H = x.shape
    assert H == K, f"expected {K} input features, got {H}"
    assert num_classes <= CPAD
    # Best performance when N is a multiple of 8 (sublane-aligned reshapes).

    wslab, bslab = pack_params(params)

    TB = _choose_tb(B, N, target_rows)
    grid = (B // TB,)

    out = pl.pallas_call(
        _make_kernel(TB, N, num_classes),
        out_shape=jax.ShapeDtypeStruct((B, N, num_classes), jnp.float32),
        grid=grid,
        in_specs=[
            pl.BlockSpec((TB, N, K), lambda b: (b, 0, 0)),
            pl.BlockSpec((SLAB_ROWS, WLANES), lambda b: (0, 0)),   # resident weights
            pl.BlockSpec((BIAS_ROWS, WLANES), lambda b: (0, 0)),   # resident f32 biases
        ],
        out_specs=pl.BlockSpec((TB, N, num_classes), lambda b: (b, 0, 0)),
        compiler_params=pltpu.CompilerParams(
            dimension_semantics=("parallel",),
            vmem_limit_bytes=40 * 1024 * 1024,
        ),
    )(x.astype(jnp.float32), wslab, bslab)

    return out


# --------------------------------------------------------------------------
# Deterministic params (eval-mode BN folded in) and plain-JAX reference
# --------------------------------------------------------------------------
def init_params(key, num_classes):
    """Deterministic params; BN (eval mode, default init) folded into weights."""
    eps = 1e-5
    bn_scale = 1.0 / float(np.sqrt(1.0 + eps))  # gamma=1, beta=0, mean=0, var=1
    layer_defs = [
        # (w_name, b_name, cin, cout, fold_bn)
        ("tw1", "tb1", K, 16, True),
        ("tw2", "tb2", 16, 32, True),
        ("tw3", "tb3", 32, 64, True),
        ("tf1w", "tf1b", 64, 32, True),
        ("tf2w", "tf2b", 32, 16, True),
        ("tf3w", "tf3b", 16, K * K, False),
        ("w1", "b1", K, 16, True),
        ("w2", "b2", 16, 32, True),
        ("w3", "b3", 32, 64, True),
        ("w4", "b4", 80, 32, True),
        ("w5", "b5", 32, 16, True),
        ("w6", "b6", 16, num_classes, False),
    ]
    params = {}
    keys = jax.random.split(key, 2 * len(layer_defs))
    for idx, (wn, bn, cin, cout, fold_bn) in enumerate(layer_defs):
        bound = 1.0 / float(np.sqrt(cin))
        w = jax.random.uniform(keys[2 * idx], (cin, cout), jnp.float32, -bound, bound)
        b = jax.random.uniform(keys[2 * idx + 1], (1, cout), jnp.float32, -bound, bound)
        if fold_bn:
            w = w * bn_scale
            b = b * bn_scale
        params[wn] = w
        params[bn] = b
    return params


def ref_forward(x, p):
    """Plain-JAX reference of PointNetSeg.forward (channels-last layout)."""
    B, N, _ = x.shape

    def lin(a, wn, bn):
        return a @ p[wn] + p[bn]

    def relu(a):
        return jnp.maximum(a, 0.0)

    # TNet
    h = relu(lin(x, "tw1", "tb1"))
    h = relu(lin(h, "tw2", "tb2"))
    h = relu(lin(h, "tw3", "tb3"))
    g = jnp.max(h, axis=1)                          # (B, 64)
    g = relu(g @ p["tf1w"] + p["tf1b"])
    g = relu(g @ p["tf2w"] + p["tf2b"])
    g = g @ p["tf3w"] + p["tf3b"]                   # (B, K*K)
    trans = g.reshape(B, K, K) + jnp.eye(K, dtype=jnp.float32)
    xt = jnp.einsum("bnk,bkj->bnj", x, trans)

    x1 = relu(lin(xt, "w1", "b1"))
    x2 = relu(lin(x1, "w2", "b2"))
    x3 = lin(x2, "w3", "b3")
    xc = jnp.concatenate([x3, x1], axis=-1)         # (B, N, 80)
    h = relu(lin(xc, "w4", "b4"))
    h = relu(lin(h, "w5", "b5"))
    return lin(h, "w6", "b6")                       # (B, N, num_classes)


if __name__ == "__main__":
    key = jax.random.PRNGKey(0)
    k_inp, k_par = jax.random.split(key)

    B, N, num_classes = 2, 16, 4
    # module input is (B, N, H) with H == 5
    x = jax.random.normal(k_inp, (B, N, K), jnp.float32)
    params = init_params(k_par, num_classes)

    out = pointnet_seg(x, params, num_classes)
    out = jax.block_until_ready(out)
    assert out.shape == (B, N, num_classes)

    with jax.default_matmul_precision("highest"):
        ref = ref_forward(x, params)
    # bf16 MXU inputs (f32 accumulation, f32 biases) -> slightly looser tolerance.
    if not jnp.allclose(out, ref, rtol=2e-2, atol=2e-2):
        err = float(jnp.max(jnp.abs(out - ref)))
        raise AssertionError(f"Pallas kernel does not match reference (max abs err={err})")

    print("KERNEL_OK")
</pallas_src>

<mosaic_0001>
module attributes {stable_mosaic.version = 11 : i64} {
  func.func @kernel(%arg0: i32, %arg1: memref<1x16x5xf32, #tpu.memory_space<vmem>>, %arg2: memref<1408x256xbf16, #tpu.memory_space<vmem>>, %arg3: memref<88x256xf32, #tpu.memory_space<vmem>>, %arg4: memref<1x16x4xf32, #tpu.memory_space<vmem>>) attributes {dimension_semantics = [#tpu.dimension_semantics<parallel>], iteration_bounds = array<i64: 2>, scalar_prefetch = 0 : i64, scratch_operands = 0 : i64, tpu.core_type = #tpu.core_type<tc>, window_params = [{transform_indices = @transform_0, window_bounds = array<i64: 1, 16, 5>}, {pipeline_mode = #tpu.pipeline_mode<synchronous>, transform_indices = @transform_1, window_bounds = array<i64: 1408, 256>}, {pipeline_mode = #tpu.pipeline_mode<synchronous>, transform_indices = @transform_2, window_bounds = array<i64: 88, 256>}, {transform_indices = @transform_3, window_bounds = array<i64: 1, 16, 4>}]} {
    %c0 = arith.constant 0 : index
    %c0_0 = arith.constant 0 : index
    %c0_1 = arith.constant 0 : index
    %0 = vector.load %arg1[%c0, %c0_0, %c0_1] : memref<1x16x5xf32, #tpu.memory_space<vmem>>, vector<1x16x5xf32>
    %cst = arith.constant 0.000000e+00 : f32
    %1 = vector.broadcast %cst : f32 to vector<1x16x3xf32>
    %2 = tpu.concatenate %0, %1 in 2 : vector<1x16x5xf32>, vector<1x16x3xf32> -> vector<1x16x8xf32>
    %3 = vector.shape_cast %2 : vector<1x16x8xf32> to vector<16x8xf32>
    %4 = arith.truncf %3 : vector<16x8xf32> to vector<16x8xbf16>
    %c0_2 = arith.constant 0 : index
    %c0_3 = arith.constant 0 : index
    %5 = vector.load %arg2[%c0_2, %c0_3] : memref<1408x256xbf16, #tpu.memory_space<vmem>>, vector<8x128xbf16>
    %cst_4 = arith.constant dense<0.000000e+00> : vector<16x128xf32>
    %6 = tpu.matmul %4, %5, %cst_4 {dimension_numbers = #tpu.dot_dimension_numbers<[1], [0], [0], [1], [0, 0, 1, 1], [], []>} : vector<16x8xbf16>, vector<8x128xbf16>, vector<16x128xf32> -> vector<16x128xf32>
    %c0_5 = arith.constant 0 : index
    %c0_6 = arith.constant 0 : index
    %7 = vector.load %arg3[%c0_5, %c0_6] : memref<88x256xf32, #tpu.memory_space<vmem>>, vector<1x128xf32>
    %8 = vector.broadcast %7 : vector<1x128xf32> to vector<16x128xf32>
    %9 = arith.addf %6, %8 : vector<16x128xf32>
    %cst_7 = arith.constant 0.000000e+00 : f32
    %10 = vector.broadcast %cst_7 : f32 to vector<16x128xf32>
    %11 = arith.maximumf %9, %10 : vector<16x128xf32>
    %12 = arith.truncf %11 : vector<16x128xf32> to vector<16x128xbf16>
    %c128 = arith.constant 128 : index
    %c0_8 = arith.constant 0 : index
    %13 = vector.load %arg2[%c128, %c0_8] : memref<1408x256xbf16, #tpu.memory_space<vmem>>, vector<128x128xbf16>
    %cst_9 = arith.constant dense<0.000000e+00> : vector<16x128xf32>
    %14 = tpu.matmul %12, %13, %cst_9 {dimension_numbers = #tpu.dot_dimension_numbers<[1], [0], [0], [1], [0, 0, 1, 1], [], []>} : vector<16x128xbf16>, vector<128x128xbf16>, vector<16x128xf32> -> vector<16x128xf32>
    %c8 = arith.constant 8 : index
    %c0_10 = arith.constant 0 : index
    %15 = vector.load %arg3[%c8, %c0_10] : memref<88x256xf32, #tpu.memory_space<vmem>>, vector<1x128xf32>
    %16 = vector.broadcast %15 : vector<1x128xf32> to vector<16x128xf32>
    %17 = arith.addf %14, %16 : vector<16x128xf32>
    %cst_11 = arith.constant 0.000000e+00 : f32
    %18 = vector.broadcast %cst_11 : f32 to vector<16x128xf32>
    %19 = arith.maximumf %17, %18 : vector<16x128xf32>
    %20 = arith.truncf %19 : vector<16x128xf32> to vector<16x128xbf16>
    %c256 = arith.constant 256 : index
    %c0_12 = arith.constant 0 : index
    %21 = vector.load %arg2[%c256, %c0_12] : memref<1408x256xbf16, #tpu.memory_space<vmem>>, vector<128x128xbf16>
    %cst_13 = arith.constant dense<0.000000e+00> : vector<16x128xf32>
    %22 = tpu.matmul %20, %21, %cst_13 {dimension_numbers = #tpu.dot_dimension_numbers<[1], [0], [0], [1], [0, 0, 1, 1], [], []>} : vector<16x128xbf16>, vector<128x128xbf16>, vector<16x128xf32> -> vector<16x128xf32>
    %c16 = arith.constant 16 : index
    %c0_14 = arith.constant 0 : index
    %23 = vector.load %arg3[%c16, %c0_14] : memref<88x256xf32, #tpu.memory_space<vmem>>, vector<1x128xf32>
    %24 = vector.broadcast %23 : vector<1x128xf32> to vector<16x128xf32>
    %25 = arith.addf %22, %24 : vector<16x128xf32>
    %cst_15 = arith.constant 0.000000e+00 : f32
    %26 = vector.broadcast %cst_15 : f32 to vector<16x128xf32>
    %27 = arith.maximumf %25, %26 : vector<16x128xf32>
    %28 = arith.truncf %27 : vector<16x128xf32> to vector<16x128xbf16>
    %29 = vector.shape_cast %28 : vector<16x128xbf16> to vector<1x16x128xbf16>
    %cst_16 = arith.constant dense<0xFF80> : vector<1x128xbf16>
    %30 = vector.multi_reduction <maximumf>, %29, %cst_16 [1] : vector<1x16x128xbf16> to vector<1x128xbf16>
    %c384 = arith.constant 384 : index
    %c0_17 = arith.constant 0 : index
    %31 = vector.load %arg2[%c384, %c0_17] : memref<1408x256xbf16, #tpu.memory_space<vmem>>, vector<128x128xbf16>
    %cst_18 = arith.constant dense<0.000000e+00> : vector<1x128xf32>
    %32 = tpu.matmul %30, %31, %cst_18 {dimension_numbers = #tpu.dot_dimension_numbers<[1], [0], [0], [1], [0, 0, 1, 1], [], []>} : vector<1x128xbf16>, vector<128x128xbf16>, vector<1x128xf32> -> vector<1x128xf32>
    %c24 = arith.constant 24 : index
    %c0_19 = arith.constant 0 : index
    %33 = vector.load %arg3[%c24, %c0_19] : memref<88x256xf32, #tpu.memory_space<vmem>>, vector<1x128xf32>
    %34 = arith.addf %32, %33 : vector<1x128xf32>
    %cst_20 = arith.constant 0.000000e+00 : f32
    %35 = vector.broadcast %cst_20 : f32 to vector<1x128xf32>
    %36 = arith.maximumf %34, %35 : vector<1x128xf32>
    %37 = arith.truncf %36 : vector<1x128xf32> to vector<1x128xbf16>
    %c512 = arith.constant 512 : index
    %c0_21 = arith.constant 0 : index
    %38 = vector.load %arg2[%c512, %c0_21] : memref<1408x256xbf16, #tpu.memory_space<vmem>>, vector<128x128xbf16>
    %cst_22 = arith.constant dense<0.000000e+00> : vector<1x128xf32>
    %39 = tpu.matmul %37, %38, %cst_22 {dimension_numbers = #tpu.dot_dimension_numbers<[1], [0], [0], [1], [0, 0, 1, 1], [], []>} : vector<1x128xbf16>, vector<128x128xbf16>, vector<1x128xf32> -> vector<1x128xf32>
    %c32 = arith.constant 32 : index
    %c0_23 = arith.constant 0 : index
    %40 = vector.load %arg3[%c32, %c0_23] : memref<88x256xf32, #tpu.memory_space<vmem>>, vector<1x128xf32>
    %41 = arith.addf %39, %40 : vector<1x128xf32>
    %cst_24 = arith.constant 0.000000e+00 : f32
    %42 = vector.broadcast %cst_24 : f32 to vector<1x128xf32>
    %43 = arith.maximumf %41, %42 : vector<1x128xf32>
    %44 = arith.truncf %43 : vector<1x128xf32> to vector<1x128xbf16>
    %c640 = arith.constant 640 : index
    %c0_25 = arith.constant 0 : index
    %45 = vector.load %arg2[%c640, %c0_25] : memref<1408x256xbf16, #tpu.memory_space<vmem>>, vector<128x128xbf16>
    %cst_26 = arith.constant dense<0.000000e+00> : vector<1x128xf32>
    %46 = tpu.matmul %44, %45, %cst_26 {dimension_numbers = #tpu.dot_dimension_numbers<[1], [0], [0], [1], [0, 0, 1, 1], [], []>} : vector<1x128xbf16>, vector<128x128xbf16>, vector<1x128xf32> -> vector<1x128xf32>
    %c40 = arith.constant 40 : index
    %c0_27 = arith.constant 0 : index
    %47 = vector.load %arg3[%c40, %c0_27] : memref<88x256xf32, #tpu.memory_space<vmem>>, vector<1x128xf32>
    %48 = arith.addf %46, %47 : vector<1x128xf32>
    %49 = vector.shape_cast %48 : vector<1x128xf32> to vector<1x1x128xf32>
    %50 = vector.extract_strided_slice %2 {offsets = [0, 0, 0], sizes = [1, 16, 1], strides = [1, 1, 1]} : vector<1x16x8xf32> to vector<1x16x1xf32>
    %51 = vector.extract_strided_slice %49 {offsets = [0, 0, 0], sizes = [1, 1, 8], strides = [1, 1, 1]} : vector<1x1x128xf32> to vector<1x1x8xf32>
    %52 = vector.broadcast %50 : vector<1x16x1xf32> to vector<1x16x8xf32>
    %53 = vector.broadcast %51 : vector<1x1x8xf32> to vector<1x16x8xf32>
    %54 = arith.mulf %52, %53 : vector<1x16x8xf32>
    %55 = arith.addf %2, %54 : vector<1x16x8xf32>
    %56 = vector.extract_strided_slice %2 {offsets = [0, 0, 1], sizes = [1, 16, 1], strides = [1, 1, 1]} : vector<1x16x8xf32> to vector<1x16x1xf32>
    %57 = vector.extract_strided_slice %49 {offsets = [0, 0, 8], sizes = [1, 1, 8], strides = [1, 1, 1]} : vector<1x1x128xf32> to vector<1x1x8xf32>
    %58 = vector.broadcast %56 : vector<1x16x1xf32> to vector<1x16x8xf32>
    %59 = vector.broadcast %57 : vector<1x1x8xf32> to vector<1x16x8xf32>
    %60 = arith.mulf %58, %59 : vector<1x16x8xf32>
    %61 = arith.addf %55, %60 : vector<1x16x8xf32>
    %62 = vector.extract_strided_slice %2 {offsets = [0, 0, 2], sizes = [1, 16, 1], strides = [1, 1, 1]} : vector<1x16x8xf32> to vector<1x16x1xf32>
    %63 = vector.extract_strided_slice %49 {offsets = [0, 0, 16], sizes = [1, 1, 8], strides = [1, 1, 1]} : vector<1x1x128xf32> to vector<1x1x8xf32>
    %64 = vector.broadcast %62 : vector<1x16x1xf32> to vector<1x16x8xf32>
    %65 = vector.broadcast %63 : vector<1x1x8xf32> to vector<1x16x8xf32>
    %66 = arith.mulf %64, %65 : vector<1x16x8xf32>
    %67 = arith.addf %61, %66 : vector<1x16x8xf32>
    %68 = vector.extract_strided_slice %2 {offsets = [0, 0, 3], sizes = [1, 16, 1], strides = [1, 1, 1]} : vector<1x16x8xf32> to vector<1x16x1xf32>
    %69 = vector.extract_strided_slice %49 {offsets = [0, 0, 24], sizes = [1, 1, 8], strides = [1, 1, 1]} : vector<1x1x128xf32> to vector<1x1x8xf32>
    %70 = vector.broadcast %68 : vector<1x16x1xf32> to vector<1x16x8xf32>
    %71 = vector.broadcast %69 : vector<1x1x8xf32> to vector<1x16x8xf32>
    %72 = arith.mulf %70, %71 : vector<1x16x8xf32>
    %73 = arith.addf %67, %72 : vector<1x16x8xf32>
    %74 = vector.extract_strided_slice %2 {offsets = [0, 0, 4], sizes = [1, 16, 1], strides = [1, 1, 1]} : vector<1x16x8xf32> to vector<1x16x1xf32>
    %75 = vector.extract_strided_slice %49 {offsets = [0, 0, 32], sizes = [1, 1, 8], strides = [1, 1, 1]} : vector<1x1x128xf32> to vector<1x1x8xf32>
    %76 = vector.broadcast %74 : vector<1x16x1xf32> to vector<1x16x8xf32>
    %77 = vector.broadcast %75 : vector<1x1x8xf32> to vector<1x16x8xf32>
    %78 = arith.mulf %76, %77 : vector<1x16x8xf32>
    %79 = arith.addf %73, %78 : vector<1x16x8xf32>
    %80 = vector.shape_cast %79 : vector<1x16x8xf32> to vector<16x8xf32>
    %81 = arith.truncf %80 : vector<16x8xf32> to vector<16x8xbf16>
    %c768 = arith.constant 768 : index
    %c0_28 = arith.constant 0 : index
    %82 = vector.load %arg2[%c768, %c0_28] : memref<1408x256xbf16, #tpu.memory_space<vmem>>, vector<8x128xbf16>
    %cst_29 = arith.constant dense<0.000000e+00> : vector<16x128xf32>
    %83 = tpu.matmul %81, %82, %cst_29 {dimension_numbers = #tpu.dot_dimension_numbers<[1], [0], [0], [1], [0, 0, 1, 1], [], []>} : vector<16x8xbf16>, vector<8x128xbf16>, vector<16x128xf32> -> vector<16x128xf32>
    %c48 = arith.constant 48 : index
    %c0_30 = arith.constant 0 : index
    %84 = vector.load %arg3[%c48, %c0_30] : memref<88x256xf32, #tpu.memory_space<vmem>>, vector<1x128xf32>
    %85 = vector.broadcast %84 : vector<1x128xf32> to vector<16x128xf32>
    %86 = arith.addf %83, %85 : vector<16x128xf32>
    %cst_31 = arith.constant 0.000000e+00 : f32
    %87 = vector.broadcast %cst_31 : f32 to vector<16x128xf32>
    %88 = arith.maximumf %86, %87 : vector<16x128xf32>
    %89 = arith.truncf %88 : vector<16x128xf32> to vector<16x128xbf16>
    %c896 = arith.constant 896 : index
    %c0_32 = arith.constant 0 : index
    %90 = vector.load %arg2[%c896, %c0_32] : memref<1408x256xbf16, #tpu.memory_space<vmem>>, vector<128x256xbf16>
    %cst_33 = arith.constant dense<0.000000e+00> : vector<16x256xf32>
    %91 = tpu.matmul %89, %90, %cst_33 {dimension_numbers = #tpu.dot_dimension_numbers<[1], [0], [0], [1], [0, 0, 1, 1], [], []>} : vector<16x128xbf16>, vector<128x256xbf16>, vector<16x256xf32> -> vector<16x256xf32>
    %c56 = arith.constant 56 : index
    %c0_34 = arith.constant 0 : index
    %92 = vector.load %arg3[%c56, %c0_34] : memref<88x256xf32, #tpu.memory_space<vmem>>, vector<1x256xf32>
    %93 = vector.broadcast %92 : vector<1x256xf32> to vector<16x256xf32>
    %94 = arith.addf %91, %93 : vector<16x256xf32>
    %95 = vector.extract_strided_slice %94 {offsets = [0, 0], sizes = [16, 128], strides = [1, 1]} : vector<16x256xf32> to vector<16x128xf32>
    %cst_35 = arith.constant 0.000000e+00 : f32
    %96 = vector.broadcast %cst_35 : f32 to vector<16x128xf32>
    %97 = arith.maximumf %95, %96 : vector<16x128xf32>
    %98 = arith.truncf %97 : vector<16x128xf32> to vector<16x128xbf16>
    %99 = vector.extract_strided_slice %94 {offsets = [0, 128], sizes = [16, 128], strides = [1, 1]} : vector<16x256xf32> to vector<16x128xf32>
    %c1024 = arith.constant 1024 : index
    %c0_36 = arith.constant 0 : index
    %100 = vector.load %arg2[%c1024, %c0_36] : memref<1408x256xbf16, #tpu.memory_space<vmem>>, vector<128x128xbf16>
    %cst_37 = arith.constant dense<0.000000e+00> : vector<16x128xf32>
    %101 = tpu.matmul %98, %100, %cst_37 {dimension_numbers = #tpu.dot_dimension_numbers<[1], [0], [0], [1], [0, 0, 1, 1], [], []>} : vector<16x128xbf16>, vector<128x128xbf16>, vector<16x128xf32> -> vector<16x128xf32>
    %c64 = arith.constant 64 : index
    %c0_38 = arith.constant 0 : index
    %102 = vector.load %arg3[%c64, %c0_38] : memref<88x256xf32, #tpu.memory_space<vmem>>, vector<1x128xf32>
    %103 = vector.broadcast %102 : vector<1x128xf32> to vector<16x128xf32>
    %104 = arith.addf %101, %103 : vector<16x128xf32>
    %105 = arith.addf %104, %99 : vector<16x128xf32>
    %cst_39 = arith.constant 0.000000e+00 : f32
    %106 = vector.broadcast %cst_39 : f32 to vector<16x128xf32>
    %107 = arith.maximumf %105, %106 : vector<16x128xf32>
    %108 = arith.truncf %107 : vector<16x128xf32> to vector<16x128xbf16>
    %c1152 = arith.constant 1152 : index
    %c0_40 = arith.constant 0 : index
    %109 = vector.load %arg2[%c1152, %c0_40] : memref<1408x256xbf16, #tpu.memory_space<vmem>>, vector<128x128xbf16>
    %cst_41 = arith.constant dense<0.000000e+00> : vector<16x128xf32>
    %110 = tpu.matmul %108, %109, %cst_41 {dimension_numbers = #tpu.dot_dimension_numbers<[1], [0], [0], [1], [0, 0, 1, 1], [], []>} : vector<16x128xbf16>, vector<128x128xbf16>, vector<16x128xf32> -> vector<16x128xf32>
    %c72 = arith.constant 72 : index
    %c0_42 = arith.constant 0 : index
    %111 = vector.load %arg3[%c72, %c0_42] : memref<88x256xf32, #tpu.memory_space<vmem>>, vector<1x128xf32>
    %112 = vector.broadcast %111 : vector<1x128xf32> to vector<16x128xf32>
    %113 = arith.addf %110, %112 : vector<16x128xf32>
    %cst_43 = arith.constant 0.000000e+00 : f32
    %114 = vector.broadcast %cst_43 : f32 to vector<16x128xf32>
    %115 = arith.maximumf %113, %114 : vector<16x128xf32>
    %116 = arith.truncf %115 : vector<16x128xf32> to vector<16x128xbf16>
    %c1280 = arith.constant 1280 : index
    %c0_44 = arith.constant 0 : index
    %117 = vector.load %arg2[%c1280, %c0_44] : memref<1408x256xbf16, #tpu.memory_space<vmem>>, vector<128x128xbf16>
    %cst_45 = arith.constant dense<0.000000e+00> : vector<16x128xf32>
    %118 = tpu.matmul %116, %117, %cst_45 {dimension_numbers = #tpu.dot_dimension_numbers<[1], [0], [0], [1], [0, 0, 1, 1], [], []>} : vector<16x128xbf16>, vector<128x128xbf16>, vector<16x128xf32> -> vector<16x128xf32>
    %c80 = arith.constant 80 : index
    %c0_46 = arith.constant 0 : index
    %119 = vector.load %arg3[%c80, %c0_46] : memref<88x256xf32, #tpu.memory_space<vmem>>, vector<1x128xf32>
    %120 = vector.broadcast %119 : vector<1x128xf32> to vector<16x128xf32>
    %121 = arith.addf %118, %120 : vector<16x128xf32>
    %122 = vector.shape_cast %121 : vector<16x128xf32> to vector<1x16x128xf32>
    %123 = vector.extract_strided_slice %122 {offsets = [0, 0, 0], sizes = [1, 16, 4], strides = [1, 1, 1]} : vector<1x16x128xf32> to vector<1x16x4xf32>
    %c0_47 = arith.constant 0 : index
    %c0_48 = arith.constant 0 : index
    %c0_49 = arith.constant 0 : index
    %124 = vector.load %arg4[%c0_47, %c0_48, %c0_49] : memref<1x16x4xf32, #tpu.memory_space<vmem>>, vector<1x16x4xf32>
    tpu.vector_store %arg4[%c0_47, %c0_48, %c0_49], %123 {strides = array<i32>} : memref<1x16x4xf32, #tpu.memory_space<vmem>>, vector<1x16x4xf32>,
    return
  }
  func.func @transform_0(%arg0: i32) -> (i32, i32, i32) {
    %c0_i32 = arith.constant 0 : i32
    %c0_i32_0 = arith.constant 0 : i32
    %c0_i32_1 = arith.constant 0 : i32
    return %arg0, %c0_i32, %c0_i32_0 : i32, i32, i32
  }
  func.func @transform_1(%arg0: i32) -> (i32, i32) {
    %c0_i32 = arith.constant 0 : i32
    %c0_i32_0 = arith.constant 0 : i32
    %c0_i32_1 = arith.constant 0 : i32
    return %c0_i32, %c0_i32_0 : i32, i32
  }
  func.func @transform_2(%arg0: i32) -> (i32, i32) {
    %c0_i32 = arith.constant 0 : i32
    %c0_i32_0 = arith.constant 0 : i32
    %c0_i32_1 = arith.constant 0 : i32
    return %c0_i32, %c0_i32_0 : i32, i32
  }
  func.func @transform_3(%arg0: i32) -> (i32, i32, i32) {
    %c0_i32 = arith.constant 0 : i32
    %c0_i32_0 = arith.constant 0 : i32
    %c0_i32_1 = arith.constant 0 : i32
    return %arg0, %c0_i32, %c0_i32_0 : i32, i32, i32
  }
}

</mosaic_0001>

<bundles_post_ra>
// kernel: tpu_custom_call.1
= control target key start
LH: loop header
LB: loop body
LE: loop exit
PB: predicated region body
PF: predicated region fallthrough
CT: control target
= control target key end

     0   :  { %8 = vsyncpa [#allocation3], 0  ;;  %s2334_s0 = inlined_call_operand.vmem [shape: f32[2,16,5], index: 0, kind: input, shape index: {}]   ;;  %s2335_s1 = inlined_call_operand.hbm [shape: bf16[1408,256], index: 1, kind: input, shape index: {}]   ;;  %s2336_s2 = inlined_call_operand.hbm [shape: f32[88,256], index: 2, kind: input, shape index: {}]   ;;  %s2337_s3 = inlined_call_operand.vmem [shape: f32[2,16,4], index: 3, kind: output, shape index: {}]  }
   0x1   :  { %9 = vsyncpa [#allocation5], 0  ;;  %s2116_s12 = smov 0  }
   0x2 LB: > { %s2079_s13 = smov [#allocation2]   ;;  %s2122_s15 = sadd.s32 4294967295, %s2077_s12   ;;  %s2077_s12 = sphi %s2116_s12, %s15_s12  }
   0x3   : > { %s126_s14 = sshll.u32 %s2079_s13, 4  ;;  %p1523_p0 = scmp.ge.s32.totalorder %s2077_s12, 1  ;;  %s127_s14 = int_to_ptr.vmem [resolvable:$true] %s126_s14 }
   0x4   : > { %p114_p1 = scmp.lt.s32.totalorder %s2077_s12, 3  ;;  %p2338_p3 = scmp.eq.s32.totalorder %s2122_s15, 0 }
   0x5   : > { %s2080_s17 = smov [#allocation4]   ;;  %s2007_s22 = scalar_lea.hbm %s2335_s1, 22528 }
   0x6   : > { %p2126_p2 = pnand %p1523_p0, %p114_p1  ;;  %s139_s18 = sshll.u32 %s2080_s17, 4  ;;  %s2139_s18 = int_to_ptr.vmem [resolvable:$true] %s139_s18 }
   0x7   : > { %p2008_p6 = scmp.ne.s32.totalorder %s2335_s1, %s2007_s22  ;;  %p2014_p10 = scmp.lt.u32.totalorder %s2007_s22, %s2335_s1 }
   0x8   : > { %s2340_s16 = scalar_select %p2126_p2, 1, 0 }
   0x9   : > { %p1876_p4 = pneg %p2126_p2 }
   0xb   : > { %p2135_p5 = pnand %p2338_p3, %p1876_p4 }
   0xd   : > { %p2009_p7 = pneg %p2135_p5 }
   0xf   : > { %p2010_p8 = pnand %p2009_p7, %p2008_p6 }
  0x11   : > { %p2011_p9 = pneg %p2010_p8 }
  0x13   : > { %p2016_p11 = pnand %p2014_p10, %p2011_p9 }
  0x15   : > { %2019 = shalt.err (!%p2016_p11)
}
  0x16   : > { %s2020_s27 = scalar_lea.vmem %s127_s14, 22528  ;;  %p2028_p1 = scmp.lt.s32.totalorder %s127_s14, %s127_s14 }
  0x17   : > { %p2021_p12 = scmp.ne.s32.totalorder %s127_s14, %s2020_s27  ;;  %p2029_p4 = scmp.lt.s32.totalorder %s2020_s27, %s2020_s27 }
  0x19   : > { %p2023_p13 = pnand %p2021_p12, %p2009_p7  ;;  %p2030_p3 = por %p2029_p4, %p2028_p1 }
  0x1b   : > { %p2024_p0 = pneg %p2023_p13 }
  0x1d   : > { %p2031_p2 = pnand %p2030_p3, %p2024_p0 }
  0x1f   : > { %2034 = shalt.err (!%p2031_p2)
}
  0x20   : > { %s2081_s28 = smov 128   ;;  %s2082_s29 = smov 8  }
  0x21   : > { %1879 = dma.hbm_to_vmem [thread:$0]  (!%p2135_p5), %s2335_s1, 22528, %s127_s14, [#allocation3], %s2081_s28, %s2081_s28, %s2082_s29  }
  0x22   : > { %s2035_s7 = scalar_lea.hbm %s2336_s2, 2816 }
  0x23   : > { %p2036_p6 = scmp.ne.s32.totalorder %s2336_s2, %s2035_s7  ;;  %p2042_p8 = scmp.lt.u32.totalorder %s2035_s7, %s2336_s2 }
  0x25   : > { %p2038_p2 = pnand %p2036_p6, %p2009_p7 }
  0x27   : > { %p2039_p3 = pneg %p2038_p2 }
  0x29   : > { %p2044_p9 = pnand %p2042_p8, %p2039_p3 }
  0x2b   : > { %2047 = shalt.err (!%p2044_p9)
}
  0x2c   : > { %s2048_s13 = scalar_lea.vmem %s2139_s18, 2816  ;;  %p2056_p13 = scmp.lt.s32.totalorder %s2139_s18, %s2139_s18 }
  0x2d   : > { %p2049_p10 = scmp.ne.s32.totalorder %s2139_s18, %s2048_s13  ;;  %p2057_p0 = scmp.lt.s32.totalorder %s2048_s13, %s2048_s13 }
  0x2f   : > { %p2051_p11 = pnand %p2049_p10, %p2009_p7  ;;  %p2058_p1 = por %p2057_p0, %p2056_p13 }
  0x31   : > { %p2052_p12 = pneg %p2051_p11 }
  0x33   : > { %p2059_p4 = pnand %p2058_p1, %p2052_p12 }
  0x35   : > { %2062 = shalt.err (!%p2059_p4)
}
  0x36   : > { %s2083_s14 = smov 256   ;;  %s2084_s17 = smov 16  }
  0x37   : > { %1882 = dma.hbm_to_vmem [thread:$0]  (!%p2135_p5), %s2336_s2, 2816, %s2139_s18, [#allocation5], %s2083_s14, %s2083_s14, %s2084_s17  }
  0x38   : > { %p2342_p6 = scmp.ne.s32.totalorder %s2340_s16, 0 }
  0x39   : > { %p2343_p7 = scmp.eq.s32.totalorder (!%p2342_p6), %s2122_s15, 0 }
  0x3a   : > { %163 = sbr.rel (%p2342_p6) target bundleno = 2641 (0xa51), region = 32 }
  0x41   : > { %2068 = dma.done.wait (%p2343_p7), [#allocation3], 22528   ;;  %p2344_p2 = pmov %p2343_p7 }
  0x43   : > { %2070 = vsyncadd (%p2344_p2), [#allocation3], 4294944768  ;;  %p2345_p3 = pmov %p2344_p2 }
  0x44   : > { %p2346_p8 = pmov %p2344_p2 }
  0x45   : > { %2072 = dma.done.wait (%p2345_p3), [#allocation5], 2816  }
  0x46   : > { %2074 = vsyncadd (%p2346_p8), [#allocation5], 4294964480  ;;  %p191_p9 = scmp.lt.s32.totalorder %s2122_s15, 1  ;;  %v2085_v0 = vmov 0.0   ;;  %vm2086_vm0 = vmmov 0   ;;  %vm214_vm1 = vcmask 1043456  }
  0x47   : > { %1696 = vmatprep.subr.bf16.mxu0 %v2085_v0  ;;  %1698 = vmatprep.mubr.msk.bf16.mxu0 %vm2086_vm0, %v2085_v0  ;;  %vm204_vm2 = vcmask 39936   ;;  %v208_v1 = vld [vmem:[#allocation2] sm:$0xf]  ;;  %vm210_vm3 = vcmask 64512   ;;  %v1920_v9 = vld [vmem:[#allocation2 + $0x90] ss:$8 sps:$4 sm:$0xff]  }
  0x48   : > { %s2348_s15 = smov (!%p191_p9, %s2122_s15), 1  ;;  %1702 = vmatprep.subr.bf16.mxu1 %v2085_v0  ;;  %1718 = vmatprep.mubr.msk.bf16.mxu1 %vm2086_vm0, %v2085_v0  ;;  %v216_v3 = vsel %vm214_vm1, %v208_v1, 0  ;;  %v1919_v7 = vld [vmem:[#allocation2 + $0x80] ss:$8 sps:$4 sm:$0xff]   ;;  %v1922_v11 = vld [vmem:[#allocation2 + $0xb0] ss:$8 sps:$4 sm:$0xff]  }
  0x49   : > { %s1618_s16 = sshll.u32 %s2348_s15, 4  ;;  %1697 = vmatpush3.bf16.msra.mxu0 %v216_v3  ;;  %1703 = vmatpush3.bf16.msra.mxu1 %v1919_v7  ;;  %v1921_v10 = vld [vmem:[#allocation2 + $0xa0] ss:$8 sps:$4 sm:$0xff]   ;;  %v1924_v13 = vld [vmem:[#allocation2 + $0xd0] ss:$8 sps:$4 sm:$0xff]   ;;  %s2092_s23 = smov 120  }
  0x4a   : > { %s195_s22 = scalar_lea.vmem %s2334_s0, %s1618_s16  ;;  %1722 = vmatprep.subr.bf16.mxu0 %v2085_v0  ;;  %1704 = vmatprep.subr.bf16.mxu1 %v2085_v0  ;;  %v1923_v12 = vld [vmem:[#allocation2 + $0xc0] ss:$8 sps:$4 sm:$0xff]   ;;  %v1926_v15 = vld [vmem:[#allocation2 + $0xf0] ss:$8 sps:$4 sm:$0xff]   ;;  %s2093_s24 = smov 112   ;;  %vm1441_vm4 = vcmask 31744  }
  0x4b   : > { %v202_v2 = vld [vmem:[%s195_s22] sm:$0xff]  ;;  %v203_v4 = vld [vmem:[%s195_s22 + $0x8] sm:$0xff]  ;;  %v1928_v17 = vld [vmem:[#allocation2 + $0x110] ss:$8 sps:$4 sm:$0xff]   ;;  %s2094_s25 = smov 104   ;;  %s2095_s26 = smov 96  }
  0x4c   : > { %v2215_v5 = vsel %vm204_vm2, %v202_v2, 0.0  ;;  %v2217_v6 = vsel %vm204_vm2, %v203_v4, 0.0  ;;  %v1925_v14 = vld [vmem:[#allocation2 + $0xe0] ss:$8 sps:$4 sm:$0xff]   ;;  %v1930_v19 = vld [vmem:[#allocation2 + $0x130] ss:$8 sps:$4 sm:$0xff]   ;;  %s200_s29 = scalar_lea.vmem %s2337_s3, %s1618_s16 }
  0x4d   : > { %v207_v8 = vpack.c.bf16 %v2217_v6, %v2215_v5  ;;  %1705 = vmatpush3.bf16.msra.mxu1 %v1920_v9  ;;  %v1927_v16 = vld [vmem:[#allocation2 + $0x100] ss:$8 sps:$4 sm:$0xff]   ;;  %v1932_v21 = vld [vmem:[#allocation2 + $0x150] ss:$8 sps:$4 sm:$0xff]  }
  0x4e   : > { %1706 = vmatprep.subr.bf16.mxu1 %v2085_v0  ;;  %v1929_v18 = vld [vmem:[#allocation2 + $0x120] ss:$8 sps:$4 sm:$0xff]   ;;  %v1934_v33 = vld [vmem:[#allocation2 + $0x170] ss:$8 sps:$4 sm:$0xff]  }
  0x4f   : > { %1699 = vmatmul.mubr.msk.bf16.vlgmr.msra.gmra.mrb[0].mxu0 %vm210_vm3, %v207_v8  ;;  %v1931_v20 = vld [vmem:[#allocation2 + $0x140] ss:$8 sps:$4 sm:$0xff]   ;;  %v278_v35 = vld [vmem:[#allocation4 + $0x10] ss:$0 sm:$0xff] }
  0x50   : > { %1738 = vmatprep.mubr.msk.bf16.mxu0 %vm2086_vm0, %v2085_v0  ;;  %1723 = vmatpush3.bf16.msra.mxu0 %v1927_v16  ;;  %v209_v22 = vld [vmem:[#allocation4] ss:$0 sm:$0xff]  ;;  %v1936_v45 = vld [vmem:[#allocation2 + $0x190] ss:$8 sps:$4 sm:$0xff]  }
  0x51   : > { %1707 = vmatpush3.bf16.msra.mxu1 %v1921_v10  ;;  %1724 = vmatprep.subr.bf16.mxu0 %v2085_v0  ;;  %v1933_v32 = vld [vmem:[#allocation2 + $0x160] ss:$8 sps:$4 sm:$0xff]   ;;  %v1938_v47 = vld [vmem:[#allocation2 + $0x1b0] ss:$8 sps:$4 sm:$0xff]  }
  0x52   : > { %1708 = vmatprep.subr.bf16.mxu1 %v2085_v0  ;;  %v1935_v34 = vld [vmem:[#allocation2 + $0x180] ss:$8 sps:$4 sm:$0xff]   ;;  %v1940_v49 = vld [vmem:[#allocation2 + $0x1d0] ss:$8 sps:$4 sm:$0xff]  }
  0x53   : > { %v1937_v46 = vld [vmem:[#allocation2 + $0x1a0] ss:$8 sps:$4 sm:$0xff]   ;;  %v1942_v51 = vld [vmem:[#allocation2 + $0x1f0] ss:$8 sps:$4 sm:$0xff]  }
  0x54   : > { %1725 = vmatpush3.bf16.msra.mxu0 %v1928_v17  ;;  %v1939_v48 = vld [vmem:[#allocation2 + $0x1c0] ss:$8 sps:$4 sm:$0xff]   ;;  %v1944_v53 = vld [vmem:[#allocation2 + $0x210] ss:$8 sps:$4 sm:$0xff]  }
  0x55   : > { %1709 = vmatpush3.bf16.msra.mxu1 %v1922_v11  ;;  %1726 = vmatprep.subr.bf16.mxu0 %v2085_v0  ;;  %v1941_v50 = vld [vmem:[#allocation2 + $0x1e0] ss:$8 sps:$4 sm:$0xff]   ;;  %v1946_v55 = vld [vmem:[#allocation2 + $0x230] ss:$8 sps:$4 sm:$0xff]  }
  0x56   : > { %1710 = vmatprep.subr.bf16.mxu1 %v2085_v0  ;;  %v1943_v52 = vld [vmem:[#allocation2 + $0x200] ss:$8 sps:$4 sm:$0xff]   ;;  %v1948_v57 = vld [vmem:[#allocation2 + $0x250] ss:$8 sps:$4 sm:$0xff]  }
  0x57   : > { %v1945_v54 = vld [vmem:[#allocation2 + $0x220] ss:$8 sps:$4 sm:$0xff]  }
  0x58   : > { %1727 = vmatpush3.bf16.msra.mxu0 %v1929_v18  ;;  %v1947_v56 = vld [vmem:[#allocation2 + $0x240] ss:$8 sps:$4 sm:$0xff]   ;;  %v1950_v18 = vld [vmem:[#allocation2 + $0x270] ss:$8 sps:$4 sm:$0xff]  }
  0x59   : > { %1711 = vmatpush3.bf16.msra.mxu1 %v1923_v12  ;;  %1728 = vmatprep.subr.bf16.mxu0 %v2085_v0  ;;  %v387_v58 = vld [vmem:[#allocation4 + $0x20] ss:$0 sm:$0xff] }
  0x5a   : > { %1712 = vmatprep.subr.bf16.mxu1 %v2085_v0  ;;  %v1949_v17 = vld [vmem:[#allocation2 + $0x260] ss:$8 sps:$4 sm:$0xff]  }
  0x5c   : > { %1729 = vmatpush3.bf16.msra.mxu0 %v1930_v19  ;;  %v1951_v19 = vld [vmem:[#allocation2 + $0x280] ss:$8 sps:$4 sm:$0xff]  }
  0x5d   : > { %1713 = vmatpush3.bf16.msra.mxu1 %v1924_v13  ;;  %1730 = vmatprep.subr.bf16.mxu0 %v2085_v0 }
  0x5e   : > { %1714 = vmatprep.subr.bf16.mxu1 %v2085_v0 }
  0x60   : > { %1731 = vmatpush3.bf16.msra.mxu0 %v1931_v20  ;;  %v1952_v20 = vld [vmem:[#allocation2 + $0x290] ss:$8 sps:$4 sm:$0xff]  }
  0x61   : > { %1715 = vmatpush3.bf16.msra.mxu1 %v1925_v14  ;;  %1732 = vmatprep.subr.bf16.mxu0 %v2085_v0 }
  0x62   : > { %1716 = vmatprep.subr.bf16.mxu1 %v2085_v0 }
  0x64   : > { %1733 = vmatpush3.bf16.msra.mxu0 %v1932_v21  ;;  %v1953_v21 = vld [vmem:[#allocation2 + $0x2a0] ss:$8 sps:$4 sm:$0xff]  }
  0x65   : > { %1717 = vmatpush3.bf16.msra.mxu1 %v1926_v15  ;;  %1734 = vmatprep.subr.bf16.mxu0 %v2085_v0 }
  0x66   : > { %1742 = vmatprep.subr.bf16.mxu1 %v2085_v0 }
  0x68   : > { %1735 = vmatpush3.bf16.msra.mxu0 %v1933_v32 }
  0x69   : > { %1736 = vmatprep.subr.bf16.mxu0 %v2085_v0 }
  0x6c   : > { %1737 = vmatpush3.bf16.msra.mxu0 %v1934_v33 }
  0x6d   : > { %1762 = vmatprep.subr.bf16.mxu0 %v2085_v0 }
 0x122   : > { %v252_v23 = vpop.f32.mrb[0].mxu0 }
 0x123   : > { %v253_v24 = vadd.f32 %v252_v23, %v209_v22  ;;  %v1700_v25 = vpop.f32.mrb[1].mxu0  ;;  %v1955_v23 = vld [vmem:[#allocation2 + $0x2c0] ss:$8 sps:$4 sm:$0xff]  }
 0x124   : > { %v255_v26 = vpop.f32.mrb[2].mxu0  ;;  %v506_v25 = vld [vmem:[#allocation4 + $0x30] ss:$0 sm:$0xff] }
 0x125   : > { %v256_v27 = vadd.f32 %v255_v26, %v209_v22  ;;  %v1701_v28 = vpop.f32.mrb[3].mxu0  ;;  %v259_v29 = vmax.f32 %v253_v24, 0.0  ;;  %v1954_v22 = vld [vmem:[#allocation2 + $0x2b0] ss:$8 sps:$4 sm:$0xff]  }
 0x126   : > { %v1956_v24 = vld [vmem:[#allocation2 + $0x2d0] ss:$8 sps:$4 sm:$0xff]  }
 0x127   : > { %v260_v30 = vmax.f32 %v256_v27, 0.0 }
 0x129   : > { %v261_v31 = vpack.c.bf16 %v260_v30, %v259_v29  ;;  %v908_v29 = vld [vmem:[#allocation2 + $0x300] sm:$0xf] }
 0x12a   : > { %v914_v33 = vsel %vm214_vm1, %v908_v29, 0 }
 0x12b   : > { %1719 = vmatmul.mubr.bf16.vlgmr.msra.gmra.mrb[0].mxu1 %v261_v31 }
 0x12c   : > { %1758 = vmatprep.mubr.msk.bf16.mxu1 %vm2086_vm0, %v2085_v0  ;;  %1743 = vmatpush3.bf16.msra.mxu1 %v1935_v34 }
 0x12d   : > { %1744 = vmatprep.subr.bf16.mxu1 %v2085_v0 }
 0x130   : > { %1745 = vmatpush3.bf16.msra.mxu1 %v1936_v45 }
 0x131   : > { %1746 = vmatprep.subr.bf16.mxu1 %v2085_v0 }
 0x134   : > { %1747 = vmatpush3.bf16.msra.mxu1 %v1937_v46 }
 0x135   : > { %1748 = vmatprep.subr.bf16.mxu1 %v2085_v0 }
 0x138   : > { %1749 = vmatpush3.bf16.msra.mxu1 %v1938_v47 }
 0x139   : > { %1750 = vmatprep.subr.bf16.mxu1 %v2085_v0 }
 0x13c   : > { %1751 = vmatpush3.bf16.msra.mxu1 %v1939_v48 }
 0x13d   : > { %1752 = vmatprep.subr.bf16.mxu1 %v2085_v0 }
 0x140   : > { %1753 = vmatpush3.bf16.msra.mxu1 %v1940_v49 }
 0x141   : > { %1754 = vmatprep.subr.bf16.mxu1 %v2085_v0 }
 0x144   : > { %1755 = vmatpush3.bf16.msra.mxu1 %v1941_v50  ;;  %v819_v50 = vlaneseq }
 0x145   : > { %1756 = vmatprep.subr.bf16.mxu1 %v2085_v0 }
 0x148   : > { %1757 = vmatpush3.bf16.msra.mxu1 %v1942_v51  ;;  %v2287_v51 = vshrl.u32 %v819_v50, 7  ;;  %v1982_v50 = vld [vmem:[#allocation2 + $0x3f4] ss:$8 sps:$4 sm:$0xff]  }
 0x149   : > { %1782 = vmatprep.subr.bf16.mxu1 %v2085_v0 }
 0x1fe   : > { %v361_v36 = vpop.f32.mrb[0].mxu1 }
 0x1ff   : > { %v362_v37 = vadd.f32 %v361_v36, %v278_v35  ;;  %v1720_v38 = vpop.f32.mrb[1].mxu1  ;;  %v1958_v36 = vld [vmem:[#allocation2 + $0x2f0] ss:$8 sps:$4 sm:$0xff]  }
 0x200   : > { %v364_v39 = vpop.f32.mrb[2].mxu1  ;;  %v2088_v38 = vmov 1  }
 0x201   : > { %v365_v40 = vadd.f32 %v364_v39, %v278_v35  ;;  %v1721_v41 = vpop.f32.mrb[3].mxu1  ;;  %v368_v42 = vmax.f32 %v362_v37, 0.0  ;;  %v1957_v35 = vld [vmem:[#allocation2 + $0x2e0] ss:$8 sps:$4 sm:$0xff]   ;;  %v2087_v37 = vmov 2   ;;  %1912 = vset.pattern.permute.xlu0 %v2088_v38  ;;  %v2089_v39 = vmov 3  }
 0x202   : > { %1913 = vset.pattern.permute.xlu1 %v2087_v37  ;;  %828 = vperm.xlu0 %1912, %v2215_v5   ;;  %v2091_v41 = vmov 0   ;;  %v1959_v38 = vld [vmem:[#allocation2 + $0x380] ss:$8 sps:$4 sm:$0xff]  }
 0x203   : > { %v369_v43 = vmax.f32 %v365_v40, 0.0  ;;  %848 = vperm.xlu1 %1913, %v2215_v5   ;;  %v2090_v40 = vmov 4  }
 0x205   : > { %v370_v44 = vpack.c.bf16 %v369_v43, %v368_v42  ;;  %v613_v42 = vld [vmem:[#allocation4 + $0x40] ss:$0 sm:$0xff] }
 0x206   : > { %832 = vperm.xlu0 %1912, %v2217_v6  }
 0x207   : > { %1739 = vmatmul.mubr.bf16.vlgmr.msra.gmra.mrb[4].mxu0 %v370_v44  ;;  %852 = vperm.xlu1 %1913, %v2217_v6  }
 0x208   : > { %1778 = vmatprep.mubr.msk.bf16.mxu0 %vm2086_vm0, %v2085_v0  ;;  %1763 = vmatpush3.bf16.msra.mxu0 %v1943_v52 }
 0x209   : > { %1764 = vmatprep.subr.bf16.mxu0 %v2085_v0 }
 0x20a   : > { %1914 = vset.pattern.permute.xlu0 %v2089_v39 }
 0x20b   : > { %1915 = vset.pattern.permute.xlu1 %v2089_v39  ;;  %868 = vperm.xlu0 %1914, %v2215_v5  }
 0x20c   : > { %1765 = vmatpush3.bf16.msra.mxu0 %v1944_v53  ;;  %872 = vperm.xlu1 %1915, %v2217_v6  }
 0x20d   : > { %1766 = vmatprep.subr.bf16.mxu0 %v2085_v0 }
 0x20f   : > { %1917 = vset.pattern.permute.xlu0 %v2090_v40 }
 0x210   : > { %1767 = vmatpush3.bf16.msra.mxu0 %v1945_v54  ;;  %1916 = vset.pattern.permute.xlu1 %v2090_v40  ;;  %v720_v54 = vld [vmem:[#allocation4 + $0x50] ss:$0 sm:$0xff]  ;;  %v1964_v40 = vld [vmem:[#allocation2 + $0x394] ss:$8 sps:$4 sm:$0xff]  }
 0x211   : > { %1768 = vmatprep.subr.bf16.mxu0 %v2085_v0  ;;  %888 = vperm.xlu1 %1916, %v2215_v5  }
 0x212   : > { %892 = vperm.xlu0 %1917, %v2217_v6  }
 0x214   : > { %1769 = vmatpush3.bf16.msra.mxu0 %v1946_v55  ;;  %v821_v55 = vsub.s32 0, %v2287_v51 }
 0x215   : > { %1770 = vmatprep.subr.bf16.mxu0 %v2085_v0  ;;  %1918 = vset.pattern.permute.xlu1 %v2091_v41 }
 0x216   : > { %811 = vperm.xlu1 %1918, %v2215_v5  }
 0x218   : > { %1771 = vmatpush3.bf16.msra.mxu0 %v1947_v56 }
 0x219   : > { %1772 = vmatprep.subr.bf16.mxu0 %v2085_v0 }
 0x21a   : > { %816 = vperm.xlu1 %1918, %v2217_v6  }
 0x21c   : > { %1773 = vmatpush3.bf16.msra.mxu0 %v1948_v57 }
 0x21d   : > { %1774 = vmatprep.subr.bf16.mxu0 %v2085_v0 }
 0x220   : > { %1775 = vmatpush3.bf16.msra.mxu0 %v1949_v17 }
 0x221   : > { %1776 = vmatprep.subr.bf16.mxu0 %v2085_v0 }
 0x224   : > { %1777 = vmatpush3.bf16.msra.mxu0 %v1950_v18 }
 0x225   : > { %1802 = vmatprep.subr.bf16.mxu0 %v2085_v0 }
 0x281   : > { %v829_v52 = vpop.permute.xlu0 %828 }
 0x282   : > { %v849_v53 = vpop.permute.xlu1 %848 }
 0x2da   : > { %v470_v59 = vpop.f32.mrb[4].mxu0 }
 0x2db   : > { %v471_v60 = vadd.f32 %v470_v59, %v387_v58  ;;  %v1740_v61 = vpop.f32.mrb[5].mxu0  ;;  %v833_v59 = vpop.permute.xlu0 %832 }
 0x2dc   : > { %v473_v62 = vpop.f32.mrb[6].mxu0 }
 0x2dd   : > { %v474_v63 = vadd.f32 %v473_v62, %v387_v58  ;;  %v1741_v1 = vpop.f32.mrb[7].mxu0  ;;  %v477_v2 = vmax.f32 %v471_v60, 0.0 }
 0x2df   : > { %v478_v3 = vmax.f32 %v474_v63, 0.0  ;;  %v853_v63 = vpop.permute.xlu1 %852 }
 0x2e1   : > { %v479_v4 = vpack.c.bf16 %v478_v3, %v477_v2  ;;  %v869_v3 = vpop.permute.xlu0 %868 }
 0x2e3   : > { %v480_v7 = vunpack.i.l.bf16 %v479_v4  ;;  %v481_v8 = vunpack.i.h.bf16 %v479_v4 }
 0x2e5   : > { %v482_v9 = vmax.f32 %v480_v7, %v481_v8  ;;  %v873_v8 = vpop.permute.xlu1 %872 }
 0x2e7   : > { %v483_v10 = vrot.slane %v482_v9, 4 }
 0x2e9   : > { %v484_v11 = vmax.f32 %v482_v9, %v483_v10  ;;  %v1961_v9 = vld [vmem:[#allocation2 + $0x384] ss:$8 sps:$4 sm:$0xff]  }
 0x2eb   : > { %v485_v12 = vrot.slane %v484_v11, 2 }
 0x2ed   : > { %v486_v13 = vmax.f32 %v484_v11, %v485_v12  ;;  %v893_v12 = vpop.permute.xlu0 %892 }
 0x2ef   : > { %v487_v14 = vrot.slane %v486_v13, 1 }
 0x2f1   : > { %v488_v15 = vmax.f32 %v486_v13, %v487_v14  ;;  %v889_v13 = vpop.permute.xlu1 %888 }
 0x2f3   : > { %v489_v16 = vpack.i.bf16 %v488_v15, %v488_v15 }
 0x2f5   : > { %1759 = vmatmul.mubr.bf16.vlgmr.msra.gmra.mrb[4].mxu1 %v489_v16  ;;  %v812_v16 = vpop.permute.xlu1 %811 }
 0x2f6   : > { %1798 = vmatprep.mubr.msk.bf16.mxu1 %vm2086_vm0, %v2085_v0  ;;  %1783 = vmatpush3.bf16.msra.mxu1 %v1951_v19 }
 0x2f7   : > { %1784 = vmatprep.subr.bf16.mxu1 %v2085_v0 }
 0x2f9   : > { %v817_v17 = vpop.permute.xlu1 %816 }
 0x2fa   : > { %1785 = vmatpush3.bf16.msra.mxu1 %v1952_v20 }
 0x2fb   : > { %1786 = vmatprep.subr.bf16.mxu1 %v2085_v0 }
 0x2fe   : > { %1787 = vmatpush3.bf16.msra.mxu1 %v1953_v21 }
 0x2ff   : > { %1788 = vmatprep.subr.bf16.mxu1 %v2085_v0 }
 0x302   : > { %1789 = vmatpush3.bf16.msra.mxu1 %v1954_v22 }
 0x303   : > { %1790 = vmatprep.subr.bf16.mxu1 %v2085_v0 }
 0x306   : > { %1791 = vmatpush3.bf16.msra.mxu1 %v1955_v23 }
 0x307   : > { %1792 = vmatprep.subr.bf16.mxu1 %v2085_v0 }
 0x30a   : > { %1793 = vmatpush3.bf16.msra.mxu1 %v1956_v24 }
 0x30b   : > { %1794 = vmatprep.subr.bf16.mxu1 %v2085_v0 }
 0x30e   : > { %1795 = vmatpush3.bf16.msra.mxu1 %v1957_v35 }
 0x30f   : > { %1796 = vmatprep.subr.bf16.mxu1 %v2085_v0 }
 0x312   : > { %1797 = vmatpush3.bf16.msra.mxu1 %v1958_v36 }
 0x313   : > { %1808 = vmatprep.subr.bf16.mxu1 %v2085_v0 }
 0x3c8   : > { %v589_v26 = vpop.f32.mrb[4].mxu1 }
 0x3c9   : > { %v590_v27 = vadd.f32 %v589_v26, %v506_v25  ;;  %v1760_v28 = vpop.f32.mrb[5].mxu1 }
 0x3ca   : > { %v592_v30 = vpop.f32.mrb[6].mxu1 }
 0x3cb   : > { %v595_v31 = vmax.f32 %v590_v27, 0.0  ;;  %v1761_v32 = vpop.f32.mrb[7].mxu1 }
 0x3cd   : > { %v596_v34 = vpack.c.bf16 %v595_v31, %v595_v31 }
 0x3cf   : > { %1779 = vmatmul.mubr.bf16.vlgmr.msra.gmra.mrb[8].mxu0 %v596_v34 }
 0x3d0   : > { %1803 = vmatpush3.bf16.msra.mxu0 %v914_v33  ;;  %1804 = vmatprep.mubr.msk.bf16.mxu0 %vm2086_vm0, %v2085_v0 }
 0x3d1   : > { %1069 = vmatprep.subr.bf16.mxu0 %v1961_v9  ;;  %v1989_v9 = vld [vmem:[#allocation2 + $0x460] ss:$8 sps:$4 sm:$0xff]  }
 0x4a2   : > { %v696_v43 = vpop.f32.mrb[8].mxu0 }
 0x4a3   : > { %v697_v44 = vadd.f32 %v696_v43, %v613_v42  ;;  %v1780_v45 = vpop.f32.mrb[9].mxu0  ;;  %v1965_v42 = vld [vmem:[#allocation2 + $0x3a0] ss:$8 sps:$4 sm:$0xff]   ;;  %v1970_v43 = vld [vmem:[#allocation2 + $0x3b4] ss:$8 sps:$4 sm:$0xff]  }
 0x4a4   : > { %v699_v46 = vpop.f32.mrb[10].mxu0  ;;  %v1973_v45 = vld [vmem:[#allocation2 + $0x3c4] ss:$8 sps:$4 sm:$0xff]  }
 0x4a5   : > { %v702_v47 = vmax.f32 %v697_v44, 0.0  ;;  %v1781_v48 = vpop.f32.mrb[11].mxu0  ;;  %v1968_v44 = vld [vmem:[#allocation2 + $0x3b0] ss:$8 sps:$4 sm:$0xff]   ;;  %v1971_v46 = vld [vmem:[#allocation2 + $0x3c0] ss:$8 sps:$4 sm:$0xff]  }
 0x4a6   : > { %v1974_v48 = vld [vmem:[#allocation2 + $0x3d0] ss:$8 sps:$4 sm:$0xff]  }
 0x4a7   : > { %v703_v49 = vpack.c.bf16 %v702_v47, %v702_v47  ;;  %v1976_v47 = vld [vmem:[#allocation2 + $0x3d4] ss:$8 sps:$4 sm:$0xff]  }
 0x4a9   : > { %1799 = vmatmul.mubr.bf16.vlgmr.msra.gmra.mrb[8].mxu1 %v703_v49  ;;  %v1979_v49 = vld [vmem:[#allocation2 + $0x3e4] ss:$8 sps:$4 sm:$0xff]  }
 0x4aa   : > { %1824 = vmatprep.mubr.msk.bf16.mxu1 %vm2086_vm0, %v2085_v0 }
 0x57c   : > { %v803_v56 = vpop.f32.mrb[8].mxu1 }
 0x57d   : > { %v804_v57 = vadd.f32 %v803_v56, %v720_v54  ;;  %v1800_v58 = vpop.f32.mrb[9].mxu1  ;;  %v1984_v54 = vld [vmem:[#allocation2 + $0x410] ss:$8 sps:$4 sm:$0xff]   ;;  %v1985_v56 = vld [vmem:[#allocation2 + $0x420] ss:$8 sps:$4 sm:$0xff]  }
 0x57e   : > { %v806_v60 = vpop.f32.mrb[10].mxu1  ;;  %v1987_v58 = vld [vmem:[#allocation2 + $0x440] ss:$8 sps:$4 sm:$0xff]  }
 0x57f   : > { %v822_v61 = vrot.slane %v804_v57, %v821_v55  ;;  %v1801_v62 = vpop.f32.mrb[11].mxu1  ;;  %v1986_v57 = vld [vmem:[#allocation2 + $0x430] ss:$8 sps:$4 sm:$0xff]   ;;  %v909_v60 = vld [vmem:[#allocation4 + $0x60] ss:$0 sm:$0xff] }
 0x581   : > { %v836_v1 = vmul.f32 %v833_v59, %v822_v61  ;;  %v835_v2 = vmul.f32 %v829_v52, %v822_v61  ;;  %v856_v4 = vmul.f32 %v853_v63, %v822_v61  ;;  %v855_v7 = vmul.f32 %v849_v53, %v822_v61  ;;  %v1980_v52 = vld [vmem:[#allocation2 + $0x3f0] ss:$8 sps:$4 sm:$0xff]   ;;  %v1983_v53 = vld [vmem:[#allocation2 + $0x400] ss:$8 sps:$4 sm:$0xff]  }
 0x582   : > { %v876_v10 = vmul.f32 %v873_v8, %v822_v61  ;;  %v875_v11 = vmul.f32 %v869_v3, %v822_v61  ;;  %v896_v14 = vmul.f32 %v893_v12, %v822_v61  ;;  %v895_v15 = vmul.f32 %v889_v13, %v822_v61  ;;  %1809 = vmatpush3.bf16.msra.mxu1 %v1983_v53  ;;  %v1988_v59 = vld [vmem:[#allocation2 + $0x450] ss:$8 sps:$4 sm:$0xff]   ;;  %v1993_v13 = vld [vmem:[#allocation2 + $0x4a0] ss:$8 sps:$4 sm:$0xff]  }
 0x583   : > { %841 = vrot.lane.b32.xlu1 %v836_v1, %s2092_s23  ;;  %839 = vrot.lane.b32.xlu0 %v835_v2, %s2092_s23  ;;  %v824_v20 = vmul.f32 %v822_v61, %v817_v17  ;;  %v823_v21 = vmul.f32 %v822_v61, %v812_v16  ;;  %v1992_v12 = vld [vmem:[#allocation2 + $0x490] ss:$8 sps:$4 sm:$0xff]  }
 0x584   : > { %1810 = vmatprep.subr.bf16.mxu1 %v2085_v0  ;;  %v977_v16 = vld [vmem:[#allocation4 + $0x70] ss:$8 sm:$0x3] }
 0x585   : > { %v826_v24 = vadd.f32 %v824_v20, %v2217_v6  ;;  %v825_v25 = vadd.f32 %v823_v21, %v2215_v5  ;;  %v1962_v6 = vld [vmem:[#allocation2 + $0x390] ss:$8 sps:$4 sm:$0xff]   ;;  %v1967_v5 = vld [vmem:[#allocation2 + $0x3a4] ss:$8 sps:$4 sm:$0xff]   ;;  %v982_v17 = vrot.slane %v977_v16, %v821_v55 }
 0x586   : > { %1811 = vmatpush3.bf16.msra.mxu1 %v1984_v54  ;;  %v1998_v55 = vld [vmem:[#allocation2 + $0x4f0] ss:$8 sps:$4 sm:$0xff]  }
 0x587   : > { %861 = vrot.lane.b32.xlu1 %v856_v4, %s2093_s24  ;;  %859 = vrot.lane.b32.xlu0 %v855_v7, %s2093_s24 }
 0x588   : > { %1812 = vmatprep.subr.bf16.mxu1 %v2085_v0 }
 0x58a   : > { %1813 = vmatpush3.bf16.msra.mxu1 %v1985_v56 }
 0x58b   : > { %881 = vrot.lane.b32.xlu1 %v876_v10, %s2094_s25  ;;  %879 = vrot.lane.b32.xlu0 %v875_v11, %s2094_s25  ;;  %v1990_v10 = vld [vmem:[#allocation2 + $0x470] ss:$8 sps:$4 sm:$0xff]   ;;  %v1991_v11 = vld [vmem:[#allocation2 + $0x480] ss:$8 sps:$4 sm:$0xff]  }
 0x58c   : > { %1814 = vmatprep.subr.bf16.mxu1 %v2085_v0 }
 0x58e   : > { %1815 = vmatpush3.bf16.msra.mxu1 %v1986_v57 }
 0x58f   : > { %901 = vrot.lane.b32.xlu1 %v896_v14, %s2095_s26  ;;  %899 = vrot.lane.b32.xlu0 %v895_v15, %s2095_s26  ;;  %v1994_v14 = vld [vmem:[#allocation2 + $0x4b0] ss:$8 sps:$4 sm:$0xff]   ;;  %v1995_v15 = vld [vmem:[#allocation2 + $0x4c0] ss:$8 sps:$4 sm:$0xff]  }
 0x590   : > { %1816 = vmatprep.subr.bf16.mxu1 %v2085_v0 }
 0x592   : > { %1817 = vmatpush3.bf16.msra.mxu1 %v1987_v58 }
 0x593   : > { %1818 = vmatprep.subr.bf16.mxu1 %v2085_v0 }
 0x596   : > { %1819 = vmatpush3.bf16.msra.mxu1 %v1988_v59 }
 0x597   : > { %1820 = vmatprep.subr.bf16.mxu1 %v2085_v0 }
 0x59a   : > { %1821 = vmatpush3.bf16.msra.mxu1 %v1989_v9 }
 0x59b   : > { %1822 = vmatprep.subr.bf16.mxu1 %v2085_v0 }
 0x59e   : > { %1823 = vmatpush3.bf16.msra.mxu1 %v1990_v10 }
 0x59f   : > { %1848 = vmatprep.subr.bf16.mxu1 %v2085_v0 }
 0x5f5   : > { %v842_v18 = vpop.permute.xlu1 %841  ;;  %v840_v19 = vpop.permute.xlu0 %839 }
 0x5f6   : > { %v846_v26 = vadd.f32 %v842_v18, %v826_v24  ;;  %v845_v27 = vadd.f32 %v840_v19, %v825_v25 }
 0x5f9   : > { %v862_v22 = vpop.permute.xlu1 %861  ;;  %v860_v23 = vpop.permute.xlu0 %859 }
 0x5fa   : > { %v866_v30 = vadd.f32 %v862_v22, %v846_v26  ;;  %v865_v31 = vadd.f32 %v860_v23, %v845_v27  ;;  %v1996_v27 = vld [vmem:[#allocation2 + $0x4d0] ss:$8 sps:$4 sm:$0xff]  }
 0x5fd   : > { %v882_v28 = vpop.permute.xlu1 %881  ;;  %v880_v29 = vpop.permute.xlu0 %879 }
 0x5fe   : > { %v886_v32 = vadd.f32 %v882_v28, %v866_v30  ;;  %v885_v33 = vadd.f32 %v880_v29, %v865_v31  ;;  %v1997_v28 = vld [vmem:[#allocation2 + $0x4e0] ss:$8 sps:$4 sm:$0xff]   ;;  %v2000_v30 = vld [vmem:[#allocation2 + $0x510] ss:$8 sps:$4 sm:$0xff]  }
 0x5ff   : > { %v1999_v29 = vld [vmem:[#allocation2 + $0x500] ss:$8 sps:$4 sm:$0xff]  }
 0x600   : > { %v2001_v31 = vld [vmem:[#allocation2 + $0x520] ss:$8 sps:$4 sm:$0xff]  }
 0x601   : > { %v902_v34 = vpop.permute.xlu1 %901  ;;  %v900_v35 = vpop.permute.xlu0 %899 }
 0x602   : > { %v906_v36 = vadd.f32 %v902_v34, %v886_v32  ;;  %v905_v37 = vadd.f32 %v900_v35, %v885_v33  ;;  %v2002_v32 = vld [vmem:[#allocation2 + $0x530] ss:$8 sps:$4 sm:$0xff]   ;;  %v2003_v33 = vld [vmem:[#allocation2 + $0x540] ss:$8 sps:$4 sm:$0xff]   ;;  %v985_v35 = vsub.s32 1, %v2287_v51 }
 0x603   : > { %v2004_v34 = vld [vmem:[#allocation2 + $0x550] ss:$8 sps:$4 sm:$0xff]  }
 0x604   : > { %v907_v39 = vpack.c.bf16 %v906_v36, %v905_v37  ;;  %v986_v36 = vrot.slane %v977_v16, %v985_v35  ;;  %v1131_v37 = vld [vmem:[#allocation4 + $0x80] ss:$0 sm:$0xff]  ;;  %v2006_v51 = vld [vmem:[#allocation2 + $0x570] ss:$8 sps:$4 sm:$0xff]  }
 0x606   : > { %1805 = vmatmul.mubr.msk.bf16.vlgmr.msra.gmra.mrb[12].mxu0 %vm210_vm3, %v907_v39 }
 0x607   : > { %1070 = vmatpush1.bf16.msra.mxu0 %v1959_v38  ;;  %1101 = vmatprep.mubr.bf16.mxu0 %v2091_v41  ;;  %v1977_v41 = vld [vmem:[#allocation2 + $0x3e0] ss:$8 sps:$4 sm:$0xff]  }
 0x608   : > { %1071 = vmatprep.subr.bf16.mxu0 %v1964_v40 }
 0x60b   : > { %1072 = vmatpush1.bf16.msra.mxu0 %v1962_v6 }
 0x60c   : > { %1073 = vmatprep.subr.bf16.mxu0 %v1967_v5 }
 0x60f   : > { %1074 = vmatpush1.bf16.msra.mxu0 %v1965_v42 }
 0x610   : > { %1075 = vmatprep.subr.bf16.mxu0 %v1970_v43 }
 0x613   : > { %1076 = vmatpush1.bf16.msra.mxu0 %v1968_v44 }
 0x614   : > { %1077 = vmatprep.subr.bf16.mxu0 %v1973_v45 }
 0x617   : > { %1078 = vmatpush1.bf16.msra.mxu0 %v1971_v46 }
 0x618   : > { %1079 = vmatprep.subr.bf16.mxu0 %v1976_v47 }
 0x61b   : > { %1080 = vmatpush1.bf16.msra.mxu0 %v1974_v48 }
 0x61c   : > { %1081 = vmatprep.subr.bf16.mxu0 %v1979_v49 }
 0x61f   : > { %1082 = vmatpush1.bf16.msra.mxu0 %v1977_v41  ;;  %v2005_v41 = vld [vmem:[#allocation2 + $0x560] ss:$8 sps:$4 sm:$0xff]  }
 0x620   : > { %1083 = vmatprep.subr.bf16.mxu0 %v1982_v50  ;;  %v1242_v50 = vld [vmem:[#allocation4 + $0x90] ss:$0 sm:$0xff] }
 0x623   : > { %1084 = vmatpush1.bf16.msra.mxu0 %v1980_v52 }
 0x624   : > { %1828 = vmatprep.subr.bf16.mxu0 %v2085_v0 }
 0x6d9   : > { %v950_v61 = vpop.f32.mrb[12].mxu0 }
 0x6da   : > { %v951_v62 = vadd.f32 %v950_v61, %v909_v60  ;;  %v1806_v63 = vpop.f32.mrb[13].mxu0 }
 0x6db   : > { %v953_v1 = vpop.f32.mrb[14].mxu0 }
 0x6dc   : > { %v954_v2 = vadd.f32 %v953_v1, %v909_v60  ;;  %v1807_v3 = vpop.f32.mrb[15].mxu0  ;;  %v957_v4 = vmax.f32 %v951_v62, 0.0  ;;  %v1351_v62 = vld [vmem:[#allocation4 + $0xa0] ss:$0 sm:$0xff] }
 0x6de   : > { %v958_v7 = vmax.f32 %v954_v2, 0.0 }
 0x6e0   : > { %v959_v8 = vpack.c.bf16 %v958_v7, %v957_v4 }
 0x6e2   : > { %1102 = vmatmul.mubr.bf16.vlgmr.msra.gmra.mrb[16].mxu0 %v959_v8 }
 0x6e3   : > { %1844 = vmatprep.mubr.msk.bf16.mxu0 %vm2086_vm0, %v2085_v0  ;;  %1829 = vmatpush3.bf16.msra.mxu0 %v1991_v11 }
 0x6e4   : > { %1830 = vmatprep.subr.bf16.mxu0 %v2085_v0 }
 0x6e7   : > { %1831 = vmatpush3.bf16.msra.mxu0 %v1992_v12 }
 0x6e8   : > { %1832 = vmatprep.subr.bf16.mxu0 %v2085_v0 }
 0x6eb   : > { %1833 = vmatpush3.bf16.msra.mxu0 %v1993_v13 }
 0x6ec   : > { %1834 = vmatprep.subr.bf16.mxu0 %v2085_v0 }
 0x6ef   : > { %1835 = vmatpush3.bf16.msra.mxu0 %v1994_v14 }
 0x6f0   : > { %1836 = vmatprep.subr.bf16.mxu0 %v2085_v0 }
 0x6f3   : > { %1837 = vmatpush3.bf16.msra.mxu0 %v1995_v15 }
 0x6f4   : > { %1838 = vmatprep.subr.bf16.mxu0 %v2085_v0 }
 0x6f7   : > { %1839 = vmatpush3.bf16.msra.mxu0 %v1996_v27 }
 0x6f8   : > { %1840 = vmatprep.subr.bf16.mxu0 %v2085_v0 }
 0x6fb   : > { %1841 = vmatpush3.bf16.msra.mxu0 %v1997_v28 }
 0x6fc   : > { %1842 = vmatprep.subr.bf16.mxu0 %v2085_v0 }
 0x6ff   : > { %1843 = vmatpush3.bf16.msra.mxu0 %v1998_v55 }
 0x7b5   : > { %v1103_v18 = vpop.f32.mrb[16].mxu0 }
 0x7b6   : > { %v1104_v19 = vadd.f32 %v1103_v18, %v982_v17  ;;  %v1105_v20 = vpop.f32.mrb[17].mxu0 }
 0x7b7   : > { %v1107_v21 = vpop.f32.mrb[18].mxu0  ;;  %v1106_v39 = vadd.f32 %v1105_v20, %v986_v36 }
 0x7b8   : > { %v1108_v22 = vadd.f32 %v1107_v21, %v982_v17  ;;  %v1109_v23 = vpop.f32.mrb[19].mxu0  ;;  %v1112_v24 = vmax.f32 %v1104_v19, 0.0 }
 0x7b9   : > { %v1110_v42 = vadd.f32 %v1109_v23, %v986_v36 }
 0x7ba   : > { %v1113_v25 = vmax.f32 %v1108_v22, 0.0 }
 0x7bc   : > { %v1114_v26 = vpack.c.bf16 %v1113_v25, %v1112_v24 }
 0x7be   : > { %1825 = vmatmul.mubr.bf16.vlgmr.msra.gmra.mrb[12].mxu1 %v1114_v26 }
 0x7bf   : > { %1864 = vmatprep.mubr.msk.bf16.mxu1 %vm2086_vm0, %v2085_v0  ;;  %1849 = vmatpush3.bf16.msra.mxu1 %v1999_v29 }
 0x7c0   : > { %1850 = vmatprep.subr.bf16.mxu1 %v2085_v0 }
 0x7c3   : > { %1851 = vmatpush3.bf16.msra.mxu1 %v2000_v30 }
 0x7c4   : > { %1852 = vmatprep.subr.bf16.mxu1 %v2085_v0 }
 0x7c7   : > { %1853 = vmatpush3.bf16.msra.mxu1 %v2001_v31 }
 0x7c8   : > { %1854 = vmatprep.subr.bf16.mxu1 %v2085_v0 }
 0x7cb   : > { %1855 = vmatpush3.bf16.msra.mxu1 %v2002_v32 }
 0x7cc   : > { %1856 = vmatprep.subr.bf16.mxu1 %v2085_v0 }
 0x7cf   : > { %1857 = vmatpush3.bf16.msra.mxu1 %v2003_v33 }
 0x7d0   : > { %1858 = vmatprep.subr.bf16.mxu1 %v2085_v0 }
 0x7d3   : > { %1859 = vmatpush3.bf16.msra.mxu1 %v2004_v34 }
 0x7d4   : > { %1860 = vmatprep.subr.bf16.mxu1 %v2085_v0 }
 0x7d7   : > { %1861 = vmatpush3.bf16.msra.mxu1 %v2005_v41 }
 0x7d8   : > { %1862 = vmatprep.subr.bf16.mxu1 %v2085_v0 }
 0x7db   : > { %1863 = vmatpush3.bf16.msra.mxu1 %v2006_v51 }
 0x891   : > { %v1214_v38 = vpop.f32.mrb[12].mxu1 }
 0x892   : > { %v1215_v40 = vadd.f32 %v1214_v38, %v1131_v37  ;;  %v1826_v6 = vpop.f32.mrb[13].mxu1 }
 0x893   : > { %v1217_v5 = vpop.f32.mrb[14].mxu1 }
 0x894   : > { %v1221_v43 = vadd.f32 %v1215_v40, %v1106_v39  ;;  %v1218_v44 = vadd.f32 %v1217_v5, %v1131_v37  ;;  %v1827_v45 = vpop.f32.mrb[15].mxu1 }
 0x896   : > { %v1222_v46 = vadd.f32 %v1218_v44, %v1110_v42  ;;  %v1223_v47 = vmax.f32 %v1221_v43, 0.0 }
 0x898   : > { %v1224_v48 = vmax.f32 %v1222_v46, 0.0 }
 0x89a   : > { %v1225_v49 = vpack.c.bf16 %v1224_v48, %v1223_v47 }
 0x89c   : > { %1845 = vmatmul.mubr.bf16.vlgmr.msra.gmra.mrb[20].mxu0 %v1225_v49 }
 0x96f   : > { %v1325_v52 = vpop.f32.mrb[20].mxu0 }
 0x970   : > { %v1326_v53 = vadd.f32 %v1325_v52, %v1242_v50  ;;  %v1846_v54 = vpop.f32.mrb[21].mxu0 }
 0x971   : > { %v1328_v56 = vpop.f32.mrb[22].mxu0 }
 0x972   : > { %v1329_v57 = vadd.f32 %v1328_v56, %v1242_v50  ;;  %v1847_v58 = vpop.f32.mrb[23].mxu0  ;;  %v1332_v59 = vmax.f32 %v1326_v53, 0.0 }
 0x974   : > { %v1333_v60 = vmax.f32 %v1329_v57, 0.0 }
 0x976   : > { %v1334_v61 = vpack.c.bf16 %v1333_v60, %v1332_v59 }
 0x978   : > { %1865 = vmatmul.mubr.bf16.vlgmr.msra.gmra.mrb[16].mxu1 %v1334_v61 }
 0xa4b   : > { %v1434_v0 = vpop.f32.mrb[16].mxu1 }
 0xa4c   : > { %v1435_v63 = vadd.f32 %v1434_v0, %v1351_v62  ;;  %v1866_v1 = vpop.f32.mrb[17].mxu1 }
 0xa4d   : > { %v1437_v2 = vpop.f32.mrb[18].mxu1 }
 0xa4e   : > { %1442 = vst.msk [vmem:[%s200_s29] sm:$0xff] %vm1441_vm4, %v1435_v63  ;;  %v1438_v3 = vadd.f32 %v1437_v2, %v1351_v62  ;;  %v1867_v4 = vpop.f32.mrb[19].mxu1 }
 0xa50   : > { %1443 = vst.msk [vmem:[%s200_s29 + $0x8] sm:$0xff] %vm1441_vm4, %v1438_v3 }
 0xa51 PF: > { %s15_s12 = sadd.s32 1, %s2077_s12  }
 0xa52   : > { %p12_p5 = scmp.ge.s32.totalorder %s15_s12, 4  }
 0xa54   :  { %14 = sbr.rel (!%p12_p5) target bundleno = 2 (0x2), region = 72 }
 0xa5b   :  { %1465 = vsyncpa [#allocation3], 1 }
 0xa5c   :  { %1467 = vsyncpa [#allocation3 + $0x1], 1 }
 0xa5d   :  { %1468 = vsyncpa [#allocation5], 1 }

</bundles_post_ra>
